<compile_context>
chip_gen: v6e
topology: v6e:2x2x1
jax: 0.10.0
libtpu: 0.0.40
codegen_flags: <defaults>
</compile_context>

<pallas_src>
import math

import jax
import jax.numpy as jnp
from jax.experimental import pallas as pl
from jax.experimental.pallas import tpu as pltpu


_LANE = 128
_MAX_COLS_VREGS = 64           # cols = 128 * c with c <= 64  ->  cols <= 8192


def _residual_add_kernel(fx_ref, x_ref, o_ref):
    # Elementwise residual hot path: o = fn(x) + x on one VMEM tile.
    # Per output vreg this is 2 vld + 1 vadd + 1 vst -> purely HBM/DMA-bound
    # on every TPU generation; no compute-side tuning is useful here.
    o_ref[...] = fx_ref[...] + x_ref[...]


def _vmem_capacity_bytes(default=64 << 20):
    """Best-effort per-chip VMEM capacity query (falls back to 64 MiB)."""
    try:
        cap = getattr(pltpu.get_tpu_info(), "vmem_capacity_bytes", None)
        if cap:
            return int(cap)
    except Exception:
        pass
    return default


def _sublane_quantum(dtype):
    """Min sublane multiple for unmasked packed stores: 8 f32, 16 bf16, 32 i8/fp8."""
    itemsize = jnp.dtype(dtype).itemsize
    return max(8, 32 // max(int(itemsize), 1))


def _lane_dense_2d(n):
    """Factor n -> (rows, cols) with cols a multiple of 128 (lane-dense) and
    cols capped at 8192. Returns None when n is not a multiple of 128 (caller
    falls back to a fused XLA add rather than emitting masked stores)."""
    if n % _LANE != 0:
        return None
    m = n // _LANE
    c = 1
    for cand in range(min(m, _MAX_COLS_VREGS), 0, -1):
        if m % cand == 0:
            c = cand
            break
    return m // c, _LANE * c


def _choose_tile_rows(rows, row_bytes, quantum, tile_budget, min_steps):
    """Pick rows-per-block: a multiple of `quantum`, ideally an exact divisor
    of `rows` (no ragged/masked final block), small enough to fit the VMEM
    tile budget, and small enough that the grid has >= `min_steps` iterations
    (v7x megacore sharding)."""
    tr_budget = max(tile_budget // row_bytes, 1)
    steps = max(pl.cdiv(rows, tr_budget), min_steps)
    steps = min(steps, rows)
    target = max(pl.cdiv(rows, steps), 1)
    if target >= rows and min_steps <= 1:
        return rows                                   # single full-extent block
    # Largest tr <= target that divides rows evenly and is quantum-aligned.
    for d in range(min(target, rows), 0, -1):
        if rows % d == 0 and d % quantum == 0:
            return d
    # No clean divisor: quantum-align and accept a (Pallas-masked) final block.
    tr = max((target // quantum) * quantum, quantum)
    return min(tr, rows)


def residual_add(fx, x, *, force_pallas=False, min_grid_steps=None):
    """Residual add: returns fx + x (same shape/dtype as x).

    Default path (force_pallas=False) is a plain `fx + x`, which XLA fuses
    into fn's epilogue — the cheapest option for this HBM-bound op. The
    standalone Pallas kernel is used when force_pallas=True.

    NOTE: the Pallas path aliases fx's buffer into the output; it is only safe
    because Residual.__call__ never uses fx afterwards.
    """
    assert fx.shape == x.shape, (fx.shape, x.shape)
    assert fx.dtype == x.dtype, (fx.dtype, x.dtype)
    orig_shape = x.shape

    if not force_pallas:
        # Perf-preferred: fused epilogue add (~2n HBM bytes vs ~4n standalone).
        return fx + x

    itemsize = jnp.dtype(x.dtype).itemsize
    n = math.prod(orig_shape) if orig_shape else 1
    total_bytes = n * itemsize

    shape2d = _lane_dense_2d(n)
    if shape2d is None:
        # TODO(synk): padded-to-128 Pallas path; fall back to the fused XLA add
        # rather than emitting masked (vst.msk) partial stores.
        return fx + x

    rows, cols = shape2d
    # Contiguous row-major reshape -> bitcast in XLA; the output alias below is
    # declared on the pallas_call operand (fx2) itself, so the custom-call
    # alias holds regardless of how XLA materializes the reshape.
    fx2 = fx.reshape(rows, cols)
    x2 = x.reshape(rows, cols)

    quantum = _sublane_quantum(x.dtype)             # 8 f32 / 16 bf16 / 32 i8
    vmem_cap = _vmem_capacity_bytes()
    live_budget = min(vmem_cap // 4, 24 << 20)      # 3 buffers, 2-deep pipeline
    tile_budget = max(512 << 10, live_budget // 6)  # ~1-4 MiB per tile
    row_bytes = cols * itemsize

    if min_grid_steps is None:
        # v7x megacore: >= 4 balanced parallel steps for tensors above a few
        # MiB so both TensorCores get work; near-free on v5e/v6e (1 TC).
        min_grid_steps = 4 if total_bytes >= (4 << 20) else 1

    tr = _choose_tile_rows(rows, row_bytes, quantum, tile_budget, min_grid_steps)
    grid = (pl.cdiv(rows, tr),)
    tile_bytes = tr * cols * itemsize
    vmem_limit = int(min(vmem_cap // 2, max(32 << 20, 8 * tile_bytes)))

    out2 = pl.pallas_call(
        _residual_add_kernel,
        out_shape=jax.ShapeDtypeStruct((rows, cols), x.dtype),
        grid_spec=pltpu.PrefetchScalarGridSpec(
            num_scalar_prefetch=0,
            grid=grid,
            in_specs=[
                pl.BlockSpec((tr, cols), lambda i: (i, 0)),
                pl.BlockSpec((tr, cols), lambda i: (i, 0)),
            ],
            out_specs=pl.BlockSpec((tr, cols), lambda i: (i, 0)),
        ),
        # fx is consumed only by this add: reuse its buffer for the output.
        input_output_aliases={0: 0},
        compiler_params=pltpu.CompilerParams(
            dimension_semantics=("parallel",),
            vmem_limit_bytes=vmem_limit,
        ),
    )(fx2, x2)

    return out2.reshape(orig_shape)


class Residual:
    """JAX/Pallas port of the PyTorch Residual module: fn(x, *a, **kw) + x."""

    def __init__(self, fn, *, force_pallas=False):
        self.fn = fn
        self._force_pallas = force_pallas

    def __call__(self, x, *args, **kwargs):
        fx = self.fn(x, *args, **kwargs)
        return residual_add(fx, x, force_pallas=self._force_pallas)


if __name__ == "__main__":
    key = jax.random.PRNGKey(0)
    kx, kw = jax.random.split(key)

    # Example input consistent with an NCHW conv-style module.
    B, C, H, W = 2, 4, 16, 16
    x = jax.random.normal(kx, (B, C, H, W), dtype=jnp.float32)

    # Demo wrapped fn: a deterministic 1x1 conv (channel mix) as plain-JAX
    # glue; the Residual module's own compute (the add) runs in Pallas.
    w = jax.random.normal(kw, (C, C), dtype=jnp.float32) * 0.1

    def pointwise_conv(x_nchw):
        # y[b,o,h,w] = sum_c w[o,c] * x[b,c,h,w]
        return jnp.einsum("oc,bchw->bohw", w, x_nchw)

    # force_pallas=True so the demo exercises the Pallas kernel; the default
    # path (per perf review) lets XLA fuse the add into fn's epilogue.
    res = Residual(pointwise_conv, force_pallas=True)
    out = jax.block_until_ready(res(x))

    ref = pointwise_conv(x) + x
    assert out.shape == x.shape and out.dtype == x.dtype
    assert jnp.allclose(out, ref, atol=1e-5, rtol=1e-5)

    # Extra self-check: bf16 input exercises the dtype-aware sublane quantum (16).
    xb = jax.random.normal(kx, (4, 128, 256), dtype=jnp.bfloat16)
    fb = jnp.tanh(xb)
    ob = jax.block_until_ready(residual_add(fb, xb, force_pallas=True))
    assert jnp.allclose(ob.astype(jnp.float32), (fb + xb).astype(jnp.float32),
                        atol=1e-2, rtol=1e-2)

    # Extra self-check: multi-step grid (divisor-aligned tiles, no ragged block).
    xm = jax.random.normal(kw, (512, 256), dtype=jnp.float32)
    fm = xm * 0.5
    om = jax.block_until_ready(
        residual_add(fm, xm, force_pallas=True, min_grid_steps=2))
    assert jnp.allclose(om, fm + xm, atol=1e-5, rtol=1e-5)

    print("KERNEL_OK")
</pallas_src>

<mosaic_0001>
module attributes {stable_mosaic.version = 11 : i64} {
  func.func @_residual_add_kernel(%arg0: i32, %arg1: memref<1x2048xf32, #tpu.memory_space<vmem>>, %arg2: memref<1x2048xf32, #tpu.memory_space<vmem>>, %arg3: memref<1x2048xf32, #tpu.memory_space<vmem>>) attributes {dimension_semantics = [#tpu.dimension_semantics<parallel>], iteration_bounds = array<i64: 1>, scalar_prefetch = 0 : i64, scratch_operands = 0 : i64, tpu.core_type = #tpu.core_type<tc>, window_params = [{transform_indices = @transform_0, window_bounds = array<i64: 1, 2048>}, {transform_indices = @transform_1, window_bounds = array<i64: 1, 2048>}, {transform_indices = @transform_2, window_bounds = array<i64: 1, 2048>}]} {
    %c0 = arith.constant 0 : index
    %c0_0 = arith.constant 0 : index
    %0 = vector.load %arg1[%c0, %c0_0] : memref<1x2048xf32, #tpu.memory_space<vmem>>, vector<1x2048xf32>
    %c0_1 = arith.constant 0 : index
    %c0_2 = arith.constant 0 : index
    %1 = vector.load %arg2[%c0_1, %c0_2] : memref<1x2048xf32, #tpu.memory_space<vmem>>, vector<1x2048xf32>
    %2 = arith.addf %0, %1 : vector<1x2048xf32>
    %c0_3 = arith.constant 0 : index
    %c0_4 = arith.constant 0 : index
    %3 = vector.load %arg3[%c0_3, %c0_4] : memref<1x2048xf32, #tpu.memory_space<vmem>>, vector<1x2048xf32>
    tpu.vector_store %arg3[%c0_3, %c0_4], %2 {strides = array<i32>} : memref<1x2048xf32, #tpu.memory_space<vmem>>, vector<1x2048xf32>,
    return
  }
  func.func @transform_0(%arg0: i32) -> (i32, i32) {
    %c0_i32 = arith.constant 0 : i32
    %c0_i32_0 = arith.constant 0 : i32
    return %arg0, %c0_i32 : i32, i32
  }
  func.func @transform_1(%arg0: i32) -> (i32, i32) {
    %c0_i32 = arith.constant 0 : i32
    %c0_i32_0 = arith.constant 0 : i32
    return %arg0, %c0_i32 : i32, i32
  }
  func.func @transform_2(%arg0: i32) -> (i32, i32) {
    %c0_i32 = arith.constant 0 : i32
    %c0_i32_0 = arith.constant 0 : i32
    return %arg0, %c0_i32 : i32, i32
  }
}

</mosaic_0001>

<bundles_post_ra>
// kernel: tpu_custom_call.1
= control target key start
LH: loop header
LB: loop body
LE: loop exit
PB: predicated region body
PF: predicated region fallthrough
CT: control target
= control target key end

     0   :  { %7 = vsyncpa [#allocation3], 0  ;;  %s122_s0 = inlined_call_operand.hbm [shape: f32[1,2048], index: 0, kind: input, shape index: {}, may-alias: {0,2}]   ;;  %s123_s1 = inlined_call_operand.vmem [shape: f32[1,2048], index: 1, kind: input, shape index: {}]   ;;  %s124_s2 = inlined_call_operand.hbm [shape: f32[1,2048], index: 2, kind: output, shape index: {}, may-alias: {0,2}]  }
   0x1   :  { %8 = vsyncpa [#allocation4], 0  ;;  %s93_s9 = smov [#allocation2]  }
   0x2   :  { %s15_s10 = sshll.u32 %s93_s9, 4  ;;  %s16_s10 = int_to_ptr.vmem [resolvable:$true] %s15_s10 }
   0x3   :  { %s57_s11 = scalar_lea.vmem %s16_s10, 256  ;;  %p62_p1 = scmp.lt.s32.totalorder %s16_s10, %s16_s10 }
   0x4   :  { %p58_p0 = scmp.ne.s32.totalorder %s16_s10, %s57_s11  ;;  %p63_p2 = scmp.lt.s32.totalorder %s57_s11, %s57_s11 }
   0x6   :  { %p64_p3 = por %p63_p2, %p62_p1 }
   0x8   :  { %p65_p4 = pnand %p64_p3, %p58_p0 }
   0xa   :  { %68 = shalt.err (!%p65_p4)
}
   0xb   :  { %18 = dma.hbm_to_vmem [thread:$0]  %s122_s0, 256, %s16_s10, [#allocation3]  }
   0xc   :  { %89 = dma.done.wait [#allocation3], 256  }
   0xd   :  { %90 = vsyncadd [#allocation3], 4294967040  ;;  %s94_s14 = smov [#allocation5]   ;;  %v24_v0 = vld [vmem:[#allocation2] sm:$0xff]  ;;  %v25_v2 = vld [vmem:[#allocation2 + $0x8] sm:$0xff] }
   0xe   :  { %s38_s15 = sshll.u32 %s94_s14, 4  ;;  %v26_v1 = vld [vmem:[%s123_s1] sm:$0xff]  ;;  %v27_v4 = vld [vmem:[%s123_s1 + $0x8] sm:$0xff]  ;;  %s39_s15 = int_to_ptr.vmem [resolvable:$true] %s38_s15 }
   0xf   :  { %v28_v3 = vadd.f32 %v26_v1, %v24_v0  ;;  %v29_v5 = vadd.f32 %v27_v4, %v25_v2  ;;  %s69_s0 = scalar_lea.vmem %s39_s15, 256  ;;  %p74_p6 = scmp.lt.s32.totalorder %s39_s15, %s39_s15 }
  0x10   :  { %p70_p5 = scmp.ne.s32.totalorder %s39_s15, %s69_s0  ;;  %p75_p7 = scmp.lt.s32.totalorder %s69_s0, %s69_s0 }
  0x11   :  { %30 = vst [vmem:[#allocation5] sm:$0xff] %v28_v3  ;;  %31 = vst [vmem:[#allocation5 + $0x8] sm:$0xff] %v29_v5 }
  0x12   :  { %p76_p8 = por %p75_p7, %p74_p6 }
  0x14   :  { %p77_p9 = pnand %p76_p8, %p70_p5 }
  0x16   :  { %80 = shalt.err (!%p77_p9)
}
  0x17   :  { %41 = dma.vmem_to_hbm [thread:$0]  %s39_s15, 256, %s124_s2, [#allocation4]  }
  0x18   :  { %91 = dma.done.wait [#allocation4], 256  }
  0x19   :  { %92 = vsyncadd [#allocation4], 4294967040 }
  0x1a   :  { %45 = vsyncpa [#allocation3], 1 }
  0x1b   :  { %46 = vsyncpa [#allocation4], 1 }

</bundles_post_ra>
